<compile_context>
chip_gen: v6e
topology: v6e:2x2x1
jax: 0.10.0
libtpu: 0.0.40
codegen_flags: <defaults>
</compile_context>

<pallas_src>
import math

import jax
import jax.numpy as jnp
from jax.experimental import pallas as pl
from jax.experimental.pallas import tpu as pltpu


_GELU_C = math.sqrt(2.0 / math.pi)


def _bert_intermediate_kernel(x_ref, w_ref, b_ref, o_ref):
    # x_ref: (tm, H)  bf16 activation rows (B*S flattened, streamed per tile)
    # w_ref: (H, I)   bf16 dense weight, VMEM-resident (constant index_map)
    # b_ref: (1, I)   f32 bias, VMEM-resident
    # o_ref: (tm, I)  f32 activated output tile (lane-dense: I % 128 == 0)
    h = jnp.dot(x_ref[...], w_ref[...], preferred_element_type=jnp.float32)
    h = h + b_ref[...]

    # GELU, tanh approximation (original BERT TF "gelu"), f32 epilogue.
    # Restructured to minimize VPU ops: inner = h * (1 + 0.044715*h^2).
    # TODO(synk): swap in the exact erf-based GELU if config.hidden_act maps
    # to the erf variant of ACT2FN["gelu"] (HF default); numerics differ ~1e-3.
    h2 = h * h
    inner = h * (1.0 + 0.044715 * h2)
    g = 0.5 * h * (1.0 + jnp.tanh(_GELU_C * inner))

    o_ref[...] = g.astype(o_ref.dtype)


def prepare_weight(weight, bias):
    """One-time weight prep (do at parameter-load time, NOT per forward call):
    [I, H] PyTorch nn.Linear layout -> [H, I] math layout, cast to bf16."""
    w_hi = jnp.asarray(weight.T, dtype=jnp.bfloat16)               # [H, I]
    b_row = jnp.asarray(bias, dtype=jnp.float32).reshape(1, -1)    # [1, I]
    return w_hi, b_row


def bert_intermediate(hidden_states, w_hi, bias_row, *, m_tile_cap=512):
    """hidden_states: [B, S, H]; w_hi: [H, I] bf16 (see prepare_weight);
    bias_row: [1, I] f32. Returns [B, S, I] f32."""
    B, S, H = hidden_states.shape
    Hw, I = w_hi.shape
    assert Hw == H and bias_row.shape == (1, I)

    M = B * S
    # Feed the MXU bf16 (f32 accumulation happens inside the kernel).
    x2 = hidden_states.reshape(M, H).astype(jnp.bfloat16)

    # Largest legal M tile: full M if small, else the cap (multiple of 8).
    # The grid uses cdiv; Pallas masks the remainder rows of the last tile.
    tm = M if M <= m_tile_cap else m_tile_cap
    grid = (pl.cdiv(M, tm),)

    # Explicit VMEM budget: double-buffered x/out + resident weight + headroom.
    vmem_bytes = (2 * tm * H * 2      # activation tiles (bf16)
                  + 2 * H * I * 2     # weight (bf16, resident)
                  + 2 * 1 * I * 4     # bias
                  + 2 * tm * I * 4    # output tiles (f32)
                  + (4 << 20))        # headroom for internal scratch
    vmem_bytes = int(min(max(vmem_bytes, 32 << 20), 64 << 20))  # <= v7x physical

    out = pl.pallas_call(
        _bert_intermediate_kernel,
        out_shape=jax.ShapeDtypeStruct((M, I), jnp.float32),
        grid_spec=pltpu.PrefetchScalarGridSpec(
            num_scalar_prefetch=0,
            grid=grid,
            in_specs=[
                pl.BlockSpec((tm, H), lambda i: (i, 0)),   # activations (streamed)
                pl.BlockSpec((H, I), lambda i: (0, 0)),    # weight (resident)
                pl.BlockSpec((1, I), lambda i: (0, 0)),    # bias (resident)
            ],
            out_specs=pl.BlockSpec((tm, I), lambda i: (i, 0)),
        ),
        compiler_params=pltpu.CompilerParams(
            dimension_semantics=("parallel",),
            vmem_limit_bytes=vmem_bytes),
    )(x2, w_hi, bias_row)

    # TODO(synk): emit bf16 output (out_shape dtype + final astype) if the
    # downstream BertOutput matmul consumes bf16 — halves writeback bytes (v6e).
    return out.reshape(B, S, I)


def _reference(hidden_states, weight, bias):
    h = hidden_states @ weight.T + bias
    return 0.5 * h * (1.0 + jnp.tanh(_GELU_C * (h + 0.044715 * (h * h * h))))


if __name__ == "__main__":
    B, S, H = 2, 8, 32
    I = 4 * H  # 128 — standard BERT intermediate ratio; lane-dense output

    key = jax.random.PRNGKey(0)
    k1, k2, k3 = jax.random.split(key, 3)

    hidden_states = jax.random.normal(k1, (B, S, H), dtype=jnp.float32)
    weight = 0.02 * jax.random.normal(k2, (I, H), dtype=jnp.float32)  # [out, in]
    bias = 0.02 * jax.random.normal(k3, (I,), dtype=jnp.float32)

    w_hi, b_row = prepare_weight(weight, bias)   # one-time weight prep

    out = bert_intermediate(hidden_states, w_hi, b_row)
    jax.block_until_ready(out)

    ref = _reference(hidden_states, weight, bias)
    assert out.shape == (B, S, I)
    # bf16 MXU operands -> looser tolerance than the pure-f32 reference.
    assert jnp.allclose(out, ref, atol=6e-3, rtol=2e-2)

    # Also exercise the multi-tile grid / index_map path (tm < M, grid > 1).
    out_tiled = bert_intermediate(hidden_states, w_hi, b_row, m_tile_cap=8)
    jax.block_until_ready(out_tiled)
    assert jnp.allclose(out_tiled, ref, atol=6e-3, rtol=2e-2)

    print("KERNEL_OK")
</pallas_src>

<mosaic_0001>
module attributes {stable_mosaic.version = 11 : i64} {
  func.func @_bert_intermediate_kernel(%arg0: i32, %arg1: memref<16x32xbf16, #tpu.memory_space<vmem>>, %arg2: memref<32x128xbf16, #tpu.memory_space<vmem>>, %arg3: memref<1x128xf32, #tpu.memory_space<vmem>>, %arg4: memref<16x128xf32, #tpu.memory_space<vmem>>) attributes {dimension_semantics = [#tpu.dimension_semantics<parallel>], iteration_bounds = array<i64: 1>, scalar_prefetch = 0 : i64, scratch_operands = 0 : i64, tpu.core_type = #tpu.core_type<tc>, window_params = [{transform_indices = @transform_0, window_bounds = array<i64: 16, 32>}, {pipeline_mode = #tpu.pipeline_mode<synchronous>, transform_indices = @transform_1, window_bounds = array<i64: 32, 128>}, {pipeline_mode = #tpu.pipeline_mode<synchronous>, transform_indices = @transform_2, window_bounds = array<i64: 1, 128>}, {transform_indices = @transform_3, window_bounds = array<i64: 16, 128>}]} {
    %c0 = arith.constant 0 : index
    %c0_0 = arith.constant 0 : index
    %0 = vector.load %arg1[%c0, %c0_0] : memref<16x32xbf16, #tpu.memory_space<vmem>>, vector<16x32xbf16>
    %c0_1 = arith.constant 0 : index
    %c0_2 = arith.constant 0 : index
    %1 = vector.load %arg2[%c0_1, %c0_2] : memref<32x128xbf16, #tpu.memory_space<vmem>>, vector<32x128xbf16>
    %cst = arith.constant dense<0.000000e+00> : vector<16x128xf32>
    %2 = tpu.matmul %0, %1, %cst {dimension_numbers = #tpu.dot_dimension_numbers<[1], [0], [0], [1], [0, 0, 1, 1], [], []>} : vector<16x32xbf16>, vector<32x128xbf16>, vector<16x128xf32> -> vector<16x128xf32>
    %c0_3 = arith.constant 0 : index
    %c0_4 = arith.constant 0 : index
    %3 = vector.load %arg3[%c0_3, %c0_4] : memref<1x128xf32, #tpu.memory_space<vmem>>, vector<1x128xf32>
    %4 = vector.broadcast %3 : vector<1x128xf32> to vector<16x128xf32>
    %5 = arith.addf %2, %4 : vector<16x128xf32>
    %6 = arith.mulf %5, %5 : vector<16x128xf32>
    %cst_5 = arith.constant 4.471500e-02 : f32
    %7 = vector.broadcast %cst_5 : f32 to vector<16x128xf32>
    %8 = arith.mulf %7, %6 : vector<16x128xf32>
    %cst_6 = arith.constant 1.000000e+00 : f32
    %9 = vector.broadcast %cst_6 : f32 to vector<16x128xf32>
    %10 = arith.addf %9, %8 : vector<16x128xf32>
    %11 = arith.mulf %5, %10 : vector<16x128xf32>
    %cst_7 = arith.constant 5.000000e-01 : f32
    %12 = vector.broadcast %cst_7 : f32 to vector<16x128xf32>
    %13 = arith.mulf %12, %5 : vector<16x128xf32>
    %cst_8 = arith.constant 0.797884583 : f32
    %14 = vector.broadcast %cst_8 : f32 to vector<16x128xf32>
    %15 = arith.mulf %14, %11 : vector<16x128xf32>
    %16 = math.tanh %15 : vector<16x128xf32>
    %cst_9 = arith.constant 1.000000e+00 : f32
    %17 = vector.broadcast %cst_9 : f32 to vector<16x128xf32>
    %18 = arith.addf %17, %16 : vector<16x128xf32>
    %19 = arith.mulf %13, %18 : vector<16x128xf32>
    %c0_10 = arith.constant 0 : index
    %c0_11 = arith.constant 0 : index
    %20 = vector.load %arg4[%c0_10, %c0_11] : memref<16x128xf32, #tpu.memory_space<vmem>>, vector<16x128xf32>
    tpu.vector_store %arg4[%c0_10, %c0_11], %19 {strides = array<i32>} : memref<16x128xf32, #tpu.memory_space<vmem>>, vector<16x128xf32>,
    return
  }
  func.func @transform_0(%arg0: i32) -> (i32, i32) {
    %c0_i32 = arith.constant 0 : i32
    %c0_i32_0 = arith.constant 0 : i32
    return %arg0, %c0_i32 : i32, i32
  }
  func.func @transform_1(%arg0: i32) -> (i32, i32) {
    %c0_i32 = arith.constant 0 : i32
    %c0_i32_0 = arith.constant 0 : i32
    %c0_i32_1 = arith.constant 0 : i32
    return %c0_i32, %c0_i32_0 : i32, i32
  }
  func.func @transform_2(%arg0: i32) -> (i32, i32) {
    %c0_i32 = arith.constant 0 : i32
    %c0_i32_0 = arith.constant 0 : i32
    %c0_i32_1 = arith.constant 0 : i32
    return %c0_i32, %c0_i32_0 : i32, i32
  }
  func.func @transform_3(%arg0: i32) -> (i32, i32) {
    %c0_i32 = arith.constant 0 : i32
    %c0_i32_0 = arith.constant 0 : i32
    return %arg0, %c0_i32 : i32, i32
  }
}

</mosaic_0001>

<bundles_post_ra>
// kernel: tpu_custom_call.1
= control target key start
LH: loop header
LB: loop body
LE: loop exit
PB: predicated region body
PF: predicated region fallthrough
CT: control target
= control target key end

     0   :  { %8 = vsyncpa [#allocation3], 0  ;;  %s296_s0 = inlined_call_operand.hbm [shape: bf16[16,32], index: 0, kind: input, shape index: {}]   ;;  %s297_s1 = inlined_call_operand.hbm [shape: bf16[32,128], index: 1, kind: input, shape index: {}]   ;;  %s298_s2 = inlined_call_operand.vmem [shape: f32[1,128], index: 2, kind: input, shape index: {}]   ;;  %s299_s3 = inlined_call_operand.hbm [shape: f32[16,128], index: 3, kind: output, shape index: {}]  }
   0x1   :  { %9 = vsyncpa [#allocation6], 0 }
   0x2   :  { %10 = vsyncpa [#allocation4], 0  ;;  %s255_s12 = smov [#allocation2]  }
   0x3   :  { %s16_s13 = sshll.u32 %s255_s12, 4  ;;  %s17_s13 = int_to_ptr.vmem [resolvable:$true] %s16_s13 }
   0x4   :  { %s197_s14 = scalar_lea.vmem %s17_s13, 128  ;;  %p202_p1 = scmp.lt.s32.totalorder %s17_s13, %s17_s13 }
   0x5   :  { %p198_p0 = scmp.ne.s32.totalorder %s17_s13, %s197_s14  ;;  %p203_p2 = scmp.lt.s32.totalorder %s197_s14, %s197_s14 }
   0x7   :  { %p204_p3 = por %p203_p2, %p202_p1 }
   0x9   :  { %p205_p4 = pnand %p204_p3, %p198_p0 }
   0xb   :  { %208 = shalt.err (!%p205_p4)
}
   0xc   :  { %s256_s15 = smov 64   ;;  %s257_s16 = smov 4  }
   0xd   :  { %22 = dma.hbm_to_vmem [thread:$0]  %s296_s0, 128, %s17_s13, [#allocation3], %s256_s15, %s256_s15, %s257_s16  }
   0xe   :  { %s258_s19 = smov [#allocation5]  }
   0xf   :  { %s28_s20 = sshll.u32 %s258_s19, 4  ;;  %s29_s20 = int_to_ptr.vmem [resolvable:$true] %s28_s20 }
  0x10   :  { %s217_s21 = scalar_lea.vmem %s29_s20, 256  ;;  %p222_p6 = scmp.lt.s32.totalorder %s29_s20, %s29_s20 }
  0x11   :  { %p218_p5 = scmp.ne.s32.totalorder %s29_s20, %s217_s21  ;;  %p223_p7 = scmp.lt.s32.totalorder %s217_s21, %s217_s21 }
  0x13   :  { %p224_p8 = por %p223_p7, %p222_p6 }
  0x15   :  { %p225_p9 = pnand %p224_p8, %p218_p5 }
  0x17   :  { %228 = shalt.err (!%p225_p9)
}
  0x18   :  { %34 = dma.hbm_to_vmem [thread:$0]  %s297_s1, 256, %s29_s20, [#allocation6], %s256_s15, %s256_s15, %s257_s16  }
  0x19   :  { %249 = dma.done.wait [#allocation3], 128  }
  0x1a   :  { %250 = vsyncadd [#allocation3], 4294967168 }
  0x1b   :  { %251 = dma.done.wait [#allocation6], 256  }
  0x1c   :  { %252 = vsyncadd [#allocation6], 4294967040  ;;  %v259_v0 = vmov 0.0   ;;  %vm260_vm0 = vmmov 0   ;;  %v182_v1 = vld [vmem:[#allocation5 + $0x8] sm:$0xff]   ;;  %v183_v2 = vld [vmem:[#allocation5] sm:$0xff]  }
  0x1d   :  { %165 = vmatprep.subr.bf16.mxu0 %v259_v0  ;;  %169 = vmatprep.mubr.msk.bf16.mxu0 %vm260_vm0, %v259_v0  ;;  %v184_v3 = vld [vmem:[#allocation2] sm:$0xff]   ;;  %vm74_vm1 = vcmask 261120   ;;  %s261_s1 = smov [#allocation7]  }
  0x1e   :  { %166 = vmatpush3.bf16.msra.mxu0 %v182_v1  ;;  %v157_v4 = vld [vmem:[%s298_s2] ss:$0 sm:$0xff]  ;;  %s144_s2 = sshll.u32 %s261_s1, 4  ;;  %s145_s2 = int_to_ptr.vmem [resolvable:$true] %s144_s2 }
  0x1f   :  { %167 = vmatprep.subr.bf16.mxu0 %v259_v0  ;;  %s229_s25 = scalar_lea.vmem %s145_s2, 256  ;;  %p234_p11 = scmp.lt.s32.totalorder %s145_s2, %s145_s2 }
  0x20   :  { %p230_p10 = scmp.ne.s32.totalorder %s145_s2, %s229_s25  ;;  %p235_p12 = scmp.lt.s32.totalorder %s229_s25, %s229_s25 }
  0x22   :  { %168 = vmatpush3.bf16.msra.mxu0 %v183_v2  ;;  %p236_p13 = por %p235_p12, %p234_p11 }
  0x24   :  { %p237_p0 = pnand %p236_p13, %p230_p10 }
  0x25   :  { %170 = vmatmul.mubr.msk.bf16.vlgmr.msra.gmra.mxu0 %vm74_vm1, %v184_v3 }
  0xe5   :  { %v112_v5 = vpop.f32.mrf.mxu0 }
  0xe6   :  { %v113_v6 = vadd.f32 %v157_v4, %v112_v5 }
  0xe7   :  { %v171_v7 = vpop.f32.mrf.mxu0 }
  0xe8   :  { %v119_v8 = vmul.f32 %v113_v6, %v113_v6  ;;  %v127_v22 = vmul.f32 0.5, %v113_v6 }
  0xe9   :  { %v115_v9 = vpop.f32.mrf.mxu0 }
  0xea   :  { %v121_v10 = vmul.f32 0.044715, %v119_v8  ;;  %v116_v11 = vadd.f32 %v157_v4, %v115_v9 }
  0xeb   :  { %v172_v12 = vpop.f32.mrf.mxu0 }
  0xec   :  { %v123_v13 = vadd.f32 1.0, %v121_v10  ;;  %v120_v14 = vmul.f32 %v116_v11, %v116_v11  ;;  %v128_v26 = vmul.f32 0.5, %v116_v11 }
  0xee   :  { %v125_v15 = vmul.f32 %v123_v13, %v113_v6  ;;  %v122_v16 = vmul.f32 0.044715, %v120_v14 }
  0xf0   :  { %v129_v17 = vmul.f32 0.7978846, %v125_v15  ;;  %v124_v18 = vadd.f32 1.0, %v122_v16 }
  0xf2   :  { %185 = vtanh.f32 %v129_v17  ;;  %v126_v19 = vmul.f32 %v124_v18, %v116_v11 }
  0xf4   :  { %v130_v20 = vmul.f32 0.7978846, %v126_v19 }
  0xf6   :  { %187 = vtanh.f32 %v130_v20 }
  0xff   :  { %v186_v21 = vpop.eup %185 }
 0x100   :  { %v133_v23 = vadd.f32 1.0, %v186_v21 }
 0x102   :  { %v135_v24 = vmul.f32 %v133_v23, %v127_v22 }
 0x103   :  { %v188_v25 = vpop.eup %187 }
 0x104   :  { %137 = vst [vmem:[#allocation7] sm:$0xff] %v135_v24  ;;  %v134_v27 = vadd.f32 1.0, %v188_v25 }
 0x106   :  { %v136_v28 = vmul.f32 %v134_v27, %v128_v26 }
 0x108   :  { %138 = vst [vmem:[#allocation7 + $0x8] sm:$0xff] %v136_v28 }
 0x109   :  { %240 = shalt.err (!%p237_p0)
}
 0x10a   :  { %s262_s26 = smov 128   ;;  %s263_s27 = smov 8  }
 0x10b   :  { %150 = dma.vmem_to_hbm [thread:$0]  %s145_s2, 256, %s299_s3, [#allocation4], %s262_s26, %s262_s26, %s263_s27  }
 0x10c   :  { %253 = dma.done.wait [#allocation4], 256  }
 0x10d   :  { %254 = vsyncadd [#allocation4], 4294967040 }
 0x10e   :  { %154 = vsyncpa [#allocation3], 1 }
 0x10f   :  { %155 = vsyncpa [#allocation6], 1 }
 0x110   :  { %156 = vsyncpa [#allocation4], 1 }

</bundles_post_ra>
